<compile_context>
chip_gen: v7x
topology: tpu7x:2x2x1
jax: 0.10.0
libtpu: 0.0.40
codegen_flags: <defaults>
</compile_context>

<pallas_src>
import functools
import math

import jax
import jax.numpy as jnp
from jax.experimental import pallas as pl
from jax.experimental.pallas import tpu as pltpu

EPS = 1e-5                                  # nn.InstanceNorm1d default
_MXU_PREC = jax.lax.Precision.HIGHEST       # f32-faithful matmuls (see header note)


def _instance_norm_rows(h, inv_l):
    """Instance norm over the lane (length) axis; one (batch, channel) per row.

    Single traversal (2 XLU reduces): s = sum(h), s2 = sum(h*h);
    biased var = E[x^2] - E[x]^2, clamped at 0 against f32 cancellation.
    """
    s = jnp.sum(h, axis=-1, keepdims=True)
    s2 = jnp.sum(h * h, axis=-1, keepdims=True)
    mu = s * inv_l
    var = jnp.maximum(s2 * inv_l - mu * mu, 0.0)
    return (h - mu) * jax.lax.rsqrt(var + EPS)


def _residual_block_kernel(x_ref, wf_ref, w2_ref, o_ref, *,
                           n_chunks, r_in, r_out, length):
    """One grid step: a (TN*C_in, L) row slab -> (TN*C_out, L) row slab.

    Walks the slab in sub-chunks of r_in = TNc*C_in rows; each chunk is one
    block-diagonal (kron) matmul per conv, so every row of the intermediate is
    exactly one (n, c) instance and the norm is a plain per-row lane reduce.
    """
    inv_l = 1.0 / float(length)

    def chunk(ci, carry):
        i0 = pl.multiple_of(ci * r_in, r_in)      # sublane-aligned chunk starts
        o0 = pl.multiple_of(ci * r_out, r_out)
        xc = x_ref[pl.ds(i0, r_in), :]            # (r_in, L)
        # Fused preconv+conv1 (biases dropped exactly -> removed by the norm).
        h = jnp.dot(wf_ref[...], xc,
                    preferred_element_type=jnp.float32, precision=_MXU_PREC)
        h = _instance_norm_rows(h, inv_l)
        h = jnp.dot(w2_ref[...], h,
                    preferred_element_type=jnp.float32, precision=_MXU_PREC)
        h = _instance_norm_rows(h, inv_l)
        # ReLU + residual (C_out == C_in so input/output chunk rows line up).
        o_ref[pl.ds(o0, r_out), :] = (jnp.maximum(h, 0.0) + xc).astype(o_ref.dtype)
        return carry

    jax.lax.fori_loop(0, n_chunks, chunk, 0, unroll=True)


def _choose_tiles(n, c_in, c_mid, c_out, length):
    """Pick (batch/block TN, batch/chunk TNc, padded N, vmem_limit_bytes)."""
    bytes_per_batch = (c_in + c_out) * length * 4        # in + out slab, f32

    # Generation-aware budgets (v7x: 64 MiB VMEM, v5e/v6e: 128 MiB).
    try:
        vmem_cap = int(getattr(pltpu.get_tpu_info(), "vmem_capacity_bytes",
                               64 * 1024 * 1024))
    except Exception:
        vmem_cap = 64 * 1024 * 1024
    if vmem_cap >= 96 * 1024 * 1024:        # v5e / v6e
        block_target = 8 * 1024 * 1024
        vmem_limit = 64 * 1024 * 1024
    else:                                   # v7x (or unknown -> tighter budget)
        block_target = 4 * 1024 * 1024
        vmem_limit = 40 * 1024 * 1024
    block_min = 1 * 1024 * 1024             # amortize ~0.35us per-grid-step overhead
    min_steps = 8                           # >= 4 steps per TensorCore on v7x

    tn_budget = max(1, block_target // bytes_per_batch)
    tn_min = max(1, -(-block_min // bytes_per_batch))
    tn_steps = max(1, -(-n // min_steps))
    tn = min(max(tn_steps, tn_min), tn_budget)   # many steps, but never tiny blocks
    tn = max(1, min(tn, n))

    # Shrink the block to the smallest TN giving the same step count (minimizes the
    # N padding added below), then keep the (TN*C, L) row-block sublane aligned.
    steps = -(-n // tn)
    tn = -(-n // steps)
    m = 8 // math.gcd(c_in, 8)
    tn = -(-tn // m) * m
    n_pad = -(-n // tn) * tn

    # Batch-per-chunk for the in-kernel loop: keep the kron-expanded matmul within one
    # 128-row MXU tile and every dynamic chunk slice sublane (8) aligned.
    cmax = max(c_in, c_mid, c_out)
    tnc = max(1, min(128 // cmax if cmax <= 128 else 1, tn))
    while tnc > 1 and ((tnc * c_in) % 8 or (tnc * c_mid) % 8 or
                       (tnc * c_out) % 8 or tn % tnc):
        tnc -= 1
    return tn, tnc, n_pad, vmem_limit


def conv1d_residual_block(x, w_pre, b_pre, w1, b1, w2, b2):
    """x: (N, C_in, L) f32.  w*: (C_out_i, C_in_i) Conv1d k=1 weights (squeezed), b*: (C_out_i,).

    Biases are accepted for API parity but have provably zero effect on the output
    (constant-over-L offsets are removed exactly by the no-affine InstanceNorms).
    """
    n, c_in, length = x.shape
    c_mid = w_pre.shape[0]
    c_out = w2.shape[0]
    assert c_out == c_in, "residual=True requires out_channel == in_channel"
    del b_pre, b1, b2   # exactly cancelled by the instance norms (see header)

    # Fuse preconv into conv1 (linear chain, no nonlinearity in between).
    w_fused = jnp.dot(w1, w_pre, precision=_MXU_PREC)    # (C_mid, C_in)

    tn, tnc, n_pad, vmem_limit = _choose_tiles(n, c_in, c_mid, c_out, length)

    # Pad N (zero batches flow through as exact zeros: 0-matmul, 0-norm, relu(0)+0).
    x_in = x if n_pad == n else jnp.pad(x, ((0, n_pad - n), (0, 0), (0, 0)))
    # Collapse (N, C, L) -> (N*C, L) in the wrapper: free row-major relabel in HBM,
    # so the kernel never reshapes and L stays whole on the lane axis.
    xm = x_in.reshape(n_pad * c_in, length)

    def block_diag(w, t):
        # kron(I_t, W): one matmul performs t independent per-batch 1x1 convs while
        # keeping each (n, c) instance on its own row for the norm reduction.
        return w if t == 1 else jnp.kron(jnp.eye(t, dtype=w.dtype), w)

    wf_bd = block_diag(w_fused, tnc)     # (TNc*C_mid, TNc*C_in)
    w2_bd = block_diag(w2, tnc)          # (TNc*C_out, TNc*C_mid)

    r_in, r_out = tnc * c_in, tnc * c_out
    n_chunks = tn // tnc
    rows_blk_in, rows_blk_out = tn * c_in, tn * c_out

    kernel = functools.partial(_residual_block_kernel, n_chunks=n_chunks,
                               r_in=r_in, r_out=r_out, length=length)
    const = lambda shape: pl.BlockSpec(shape, lambda i: tuple(0 for _ in shape))

    out = pl.pallas_call(
        kernel,
        out_shape=jax.ShapeDtypeStruct((n_pad * c_out, length), x.dtype),
        grid_spec=pltpu.PrefetchScalarGridSpec(
            num_scalar_prefetch=0,
            grid=(n_pad // tn,),
            in_specs=[
                pl.BlockSpec((rows_blk_in, length), lambda i: (i, 0)),  # x row slab
                const(wf_bd.shape),     # weights: constant index -> VMEM resident
                const(w2_bd.shape),
            ],
            out_specs=pl.BlockSpec((rows_blk_out, length), lambda i: (i, 0)),
        ),
        compiler_params=pltpu.CompilerParams(
            dimension_semantics=("parallel",),
            vmem_limit_bytes=vmem_limit,
        ),
    )(xm, wf_bd, w2_bd)

    out = out.reshape(n_pad, c_out, length)
    return out if n_pad == n else out[:n]


def _reference(x, w_pre, b_pre, w1, b1, w2, b2):
    """Plain-JAX reference of the PyTorch forward (f32-faithful precision)."""
    def conv(w, b, h):
        return jnp.einsum("oc,ncl->nol", w, h, precision=_MXU_PREC) + b[None, :, None]

    def inorm(h):
        mu = h.mean(-1, keepdims=True)
        var = ((h - mu) ** 2).mean(-1, keepdims=True)
        return (h - mu) / jnp.sqrt(var + EPS)

    h = conv(w_pre, b_pre, x)
    h = inorm(conv(w1, b1, h))
    h = inorm(conv(w2, b2, h))
    return jnp.maximum(h, 0.0) + x


if __name__ == "__main__":
    key = jax.random.PRNGKey(0)

    def make_case(k, n, c, length, c_mid=None):
        c_mid = c if c_mid is None else c_mid
        ks = jax.random.split(k, 7)
        x = jax.random.normal(ks[0], (n, c, length), dtype=jnp.float32)
        w_pre = 0.1 * jax.random.normal(ks[1], (c_mid, c), dtype=jnp.float32)
        b_pre = 0.1 * jax.random.normal(ks[2], (c_mid,), dtype=jnp.float32)
        w1 = 0.1 * jax.random.normal(ks[3], (c_mid, c_mid), dtype=jnp.float32)
        b1 = 0.1 * jax.random.normal(ks[4], (c_mid,), dtype=jnp.float32)
        w2 = 0.1 * jax.random.normal(ks[5], (c, c_mid), dtype=jnp.float32)
        b2 = 0.1 * jax.random.normal(ks[6], (c,), dtype=jnp.float32)
        return (x, w_pre, b_pre, w1, b1, w2, b2)

    k1, k2, k3, k4 = jax.random.split(key, 4)
    cases = [
        make_case(k1, 2, 8, 128),             # minimal: single block, single chunk
        make_case(k2, 8, 8, 256),             # kron block-diagonal path (TNc=8)
        make_case(k3, 20, 8, 1024),           # 2 grid steps, TNc=10 kron blocks
        make_case(k4, 8, 8, 256, c_mid=16),   # mid_channel != in/out channel
    ]

    for args in cases:
        out = jax.block_until_ready(conv1d_residual_block(*args))
        ref = jax.block_until_ready(_reference(*args))
        assert out.shape == ref.shape
        err = float(jnp.max(jnp.abs(out - ref)))
        assert jnp.allclose(out, ref, atol=1e-4, rtol=1e-4), err

    print("KERNEL_OK")
</pallas_src>

<mosaic_0001>
module attributes {stable_mosaic.version = 11 : i64} {
  func.func @_residual_block_kernel(%arg0: i32, %arg1: memref<16x128xf32, #tpu.memory_space<vmem>>, %arg2: memref<16x16xf32, #tpu.memory_space<vmem>>, %arg3: memref<16x16xf32, #tpu.memory_space<vmem>>, %arg4: memref<16x128xf32, #tpu.memory_space<vmem>>) attributes {dimension_semantics = [#tpu.dimension_semantics<parallel>], iteration_bounds = array<i64: 1>, scalar_prefetch = 0 : i64, scratch_operands = 0 : i64, tpu.core_type = #tpu.core_type<tc>, window_params = [{transform_indices = @transform_0, window_bounds = array<i64: 16, 128>}, {pipeline_mode = #tpu.pipeline_mode<synchronous>, transform_indices = @transform_1, window_bounds = array<i64: 16, 16>}, {pipeline_mode = #tpu.pipeline_mode<synchronous>, transform_indices = @transform_2, window_bounds = array<i64: 16, 16>}, {transform_indices = @transform_3, window_bounds = array<i64: 16, 128>}]} {
    %c0_i32 = arith.constant 0 : i32
    %c16_i32 = arith.constant 16 : i32
    %0 = arith.muli %c0_i32, %c16_i32 : i32
    %1 = tpu.assume_multiple %0, 16 : i32
    %c16_i32_0 = arith.constant 16 : i32
    %2 = arith.muli %c0_i32, %c16_i32_0 : i32
    %3 = tpu.assume_multiple %2, 16 : i32
    %4 = arith.index_cast %1 : i32 to index
    %c0 = arith.constant 0 : index
    %5 = vector.load %arg1[%4, %c0] : memref<16x128xf32, #tpu.memory_space<vmem>>, vector<16x128xf32>
    %c0_1 = arith.constant 0 : index
    %c0_2 = arith.constant 0 : index
    %6 = vector.load %arg2[%c0_1, %c0_2] : memref<16x16xf32, #tpu.memory_space<vmem>>, vector<16x16xf32>
    %cst = arith.constant dense<0.000000e+00> : vector<16x128xf32>
    %7 = tpu.matmul %6, %5, %cst {dimension_numbers = #tpu.dot_dimension_numbers<[1], [0], [0], [1], [0, 0, 1, 1], [], []>, precision = #tpu.contract_precision<fp32>} : vector<16x16xf32>, vector<16x128xf32>, vector<16x128xf32> -> vector<16x128xf32>
    %cst_3 = arith.constant dense<0.000000e+00> : vector<16xf32>
    %8 = vector.multi_reduction <add>, %7, %cst_3 [1] : vector<16x128xf32> to vector<16xf32>
    %9 = vector.shape_cast %8 : vector<16xf32> to vector<16x1xf32>
    %10 = arith.mulf %7, %7 : vector<16x128xf32>
    %cst_4 = arith.constant dense<0.000000e+00> : vector<16xf32>
    %11 = vector.multi_reduction <add>, %10, %cst_4 [1] : vector<16x128xf32> to vector<16xf32>
    %12 = vector.shape_cast %11 : vector<16xf32> to vector<16x1xf32>
    %cst_5 = arith.constant 7.812500e-03 : f32
    %13 = vector.broadcast %cst_5 : f32 to vector<16x1xf32>
    %14 = arith.mulf %9, %13 : vector<16x1xf32>
    %cst_6 = arith.constant 7.812500e-03 : f32
    %15 = vector.broadcast %cst_6 : f32 to vector<16x1xf32>
    %16 = arith.mulf %12, %15 : vector<16x1xf32>
    %17 = arith.mulf %14, %14 : vector<16x1xf32>
    %18 = arith.subf %16, %17 : vector<16x1xf32>
    %cst_7 = arith.constant 0.000000e+00 : f32
    %19 = vector.broadcast %cst_7 : f32 to vector<16x1xf32>
    %20 = arith.maximumf %18, %19 : vector<16x1xf32>
    %21 = vector.broadcast %14 : vector<16x1xf32> to vector<16x128xf32>
    %22 = arith.subf %7, %21 : vector<16x128xf32>
    %cst_8 = arith.constant 9.99999974E-6 : f32
    %23 = vector.broadcast %cst_8 : f32 to vector<16x1xf32>
    %24 = arith.addf %20, %23 : vector<16x1xf32>
    %25 = math.rsqrt %24 : vector<16x1xf32>
    %26 = vector.broadcast %25 : vector<16x1xf32> to vector<16x128xf32>
    %27 = arith.mulf %22, %26 : vector<16x128xf32>
    %c0_9 = arith.constant 0 : index
    %c0_10 = arith.constant 0 : index
    %28 = vector.load %arg3[%c0_9, %c0_10] : memref<16x16xf32, #tpu.memory_space<vmem>>, vector<16x16xf32>
    %cst_11 = arith.constant dense<0.000000e+00> : vector<16x128xf32>
    %29 = tpu.matmul %28, %27, %cst_11 {dimension_numbers = #tpu.dot_dimension_numbers<[1], [0], [0], [1], [0, 0, 1, 1], [], []>, precision = #tpu.contract_precision<fp32>} : vector<16x16xf32>, vector<16x128xf32>, vector<16x128xf32> -> vector<16x128xf32>
    %cst_12 = arith.constant dense<0.000000e+00> : vector<16xf32>
    %30 = vector.multi_reduction <add>, %29, %cst_12 [1] : vector<16x128xf32> to vector<16xf32>
    %31 = vector.shape_cast %30 : vector<16xf32> to vector<16x1xf32>
    %32 = arith.mulf %29, %29 : vector<16x128xf32>
    %cst_13 = arith.constant dense<0.000000e+00> : vector<16xf32>
    %33 = vector.multi_reduction <add>, %32, %cst_13 [1] : vector<16x128xf32> to vector<16xf32>
    %34 = vector.shape_cast %33 : vector<16xf32> to vector<16x1xf32>
    %cst_14 = arith.constant 7.812500e-03 : f32
    %35 = vector.broadcast %cst_14 : f32 to vector<16x1xf32>
    %36 = arith.mulf %31, %35 : vector<16x1xf32>
    %cst_15 = arith.constant 7.812500e-03 : f32
    %37 = vector.broadcast %cst_15 : f32 to vector<16x1xf32>
    %38 = arith.mulf %34, %37 : vector<16x1xf32>
    %39 = arith.mulf %36, %36 : vector<16x1xf32>
    %40 = arith.subf %38, %39 : vector<16x1xf32>
    %cst_16 = arith.constant 0.000000e+00 : f32
    %41 = vector.broadcast %cst_16 : f32 to vector<16x1xf32>
    %42 = arith.maximumf %40, %41 : vector<16x1xf32>
    %43 = vector.broadcast %36 : vector<16x1xf32> to vector<16x128xf32>
    %44 = arith.subf %29, %43 : vector<16x128xf32>
    %cst_17 = arith.constant 9.99999974E-6 : f32
    %45 = vector.broadcast %cst_17 : f32 to vector<16x1xf32>
    %46 = arith.addf %42, %45 : vector<16x1xf32>
    %47 = math.rsqrt %46 : vector<16x1xf32>
    %48 = vector.broadcast %47 : vector<16x1xf32> to vector<16x128xf32>
    %49 = arith.mulf %44, %48 : vector<16x128xf32>
    %cst_18 = arith.constant 0.000000e+00 : f32
    %50 = vector.broadcast %cst_18 : f32 to vector<16x128xf32>
    %51 = arith.maximumf %49, %50 : vector<16x128xf32>
    %52 = arith.addf %51, %5 : vector<16x128xf32>
    %53 = arith.index_cast %3 : i32 to index
    %c0_19 = arith.constant 0 : index
    %54 = vector.load %arg4[%53, %c0_19] : memref<16x128xf32, #tpu.memory_space<vmem>>, vector<16x128xf32>
    tpu.vector_store %arg4[%53, %c0_19], %52 {strides = array<i32>} : memref<16x128xf32, #tpu.memory_space<vmem>>, vector<16x128xf32>,
    %c1_i32 = arith.constant 1 : i32
    return
  }
  func.func @transform_0(%arg0: i32) -> (i32, i32) {
    %c0_i32 = arith.constant 0 : i32
    %c0_i32_0 = arith.constant 0 : i32
    return %arg0, %c0_i32 : i32, i32
  }
  func.func @transform_1(%arg0: i32) -> (i32, i32) {
    %c0_i32 = arith.constant 0 : i32
    %c0_i32_0 = arith.constant 0 : i32
    %c0_i32_1 = arith.constant 0 : i32
    return %c0_i32, %c0_i32_0 : i32, i32
  }
  func.func @transform_2(%arg0: i32) -> (i32, i32) {
    %c0_i32 = arith.constant 0 : i32
    %c0_i32_0 = arith.constant 0 : i32
    %c0_i32_1 = arith.constant 0 : i32
    return %c0_i32, %c0_i32_0 : i32, i32
  }
  func.func @transform_3(%arg0: i32) -> (i32, i32) {
    %c0_i32 = arith.constant 0 : i32
    %c0_i32_0 = arith.constant 0 : i32
    return %arg0, %c0_i32 : i32, i32
  }
}

</mosaic_0001>

<bundles_post_ra>
// kernel: tpu_custom_call.1
= control target key start
LH: loop header
LB: loop body
LE: loop exit
PB: predicated region body
PF: predicated region fallthrough
CT: control target
= control target key end

     0   :  { %8 = vsyncpa [#allocation3], 0  ;;  %s1585_s0 = inlined_call_operand.hbm [shape: f32[16,128], index: 0, kind: input, shape index: {}]   ;;  %s1586_s1 = inlined_call_operand.hbm [shape: f32[16,16], index: 1, kind: input, shape index: {}]   ;;  %s1587_s2 = inlined_call_operand.hbm [shape: f32[16,16], index: 2, kind: input, shape index: {}]   ;;  %s1588_s3 = inlined_call_operand.hbm [shape: f32[16,128], index: 3, kind: output, shape index: {}]  }
   0x1   :  { %9 = vsyncpa [#allocation6], 0 }
   0x2   :  { %10 = vsyncpa [#allocation4], 0  ;;  %s1467_s12 = smov [#allocation5]   ;;  %s1468_s14 = smov [#allocation2]  }
   0x3   :  { %s28_s13 = sshll.u32 %s1467_s12, 4  ;;  %s16_s15 = sshll.u32 %s1468_s14, 4  ;;  %s29_s13 = int_to_ptr.vmem [resolvable:$true] %s28_s13  ;;  %s1493_s15 = int_to_ptr.vmem [resolvable:$true] %s16_s15 }
   0x4   :  { %s1373_s18 = scalar_lea.hbm %s1586_s1, 256 }
   0x5   :  { %p1374_p0 = scmp.ne.s32.totalorder %s1586_s1, %s1373_s18  ;;  %p1377_p1 = scmp.lt.u32.totalorder %s1373_s18, %s1586_s1 }
   0x7   :  { %p1379_p2 = pnand %p1377_p1, %p1374_p0 }
   0x9   :  { %1382 = shalt.err (!%p1379_p2)
}
   0xa   :  { %s1383_s23 = scalar_lea.vmem %s29_s13, 256  ;;  %p1388_p4 = scmp.lt.s32.totalorder %s29_s13, %s29_s13 }
   0xb   :  { %p1384_p3 = scmp.ne.s32.totalorder %s29_s13, %s1383_s23  ;;  %p1389_p5 = scmp.lt.s32.totalorder %s1383_s23, %s1383_s23 }
   0xd   :  { %p1390_p6 = por %p1389_p5, %p1388_p4 }
   0xf   :  { %p1391_p7 = pnand %p1390_p6, %p1384_p3 }
  0x11   :  { %1394 = shalt.err (!%p1391_p7)
}
  0x12   :  { %s1469_s24 = smov 128   ;;  %s1470_s25 = smov 8  }
  0x13   :  { %34 = dma.hbm_to_vmem [thread:$0]  %s1586_s1, 256, %s29_s13, [#allocation6], %s1469_s24, %s1469_s24, %s1470_s25  }
  0x14   :  { %s1395_s30 = scalar_lea.hbm %s1585_s0, 256 }
  0x15   :  { %p1396_p8 = scmp.ne.s32.totalorder %s1585_s0, %s1395_s30  ;;  %p1399_p9 = scmp.lt.u32.totalorder %s1395_s30, %s1585_s0 }
  0x17   :  { %p1401_p10 = pnand %p1399_p9, %p1396_p8 }
  0x19   :  { %1404 = shalt.err (!%p1401_p10)
}
  0x1a   :  { %s1405_s8 = scalar_lea.vmem %s1493_s15, 256  ;;  %p1410_p12 = scmp.lt.s32.totalorder %s1493_s15, %s1493_s15 }
  0x1b   :  { %p1406_p11 = scmp.ne.s32.totalorder %s1493_s15, %s1405_s8  ;;  %p1411_p13 = scmp.lt.s32.totalorder %s1405_s8, %s1405_s8 }
  0x1d   :  { %p1412_p0 = por %p1411_p13, %p1410_p12 }
  0x1f   :  { %p1413_p1 = pnand %p1412_p0, %p1406_p11 }
  0x21   :  { %1416 = shalt.err (!%p1413_p1)
}
  0x22   :  { %22 = dma.hbm_to_vmem [thread:$0]  %s1585_s0, 256, %s1493_s15, [#allocation3], %s1469_s24, %s1469_s24, %s1470_s25  }
  0x23   :  { %s1471_s10 = smov [#allocation7]   ;;  %s1417_s14 = scalar_lea.hbm %s1587_s2, 256 }
  0x24   :  { %s40_s11 = sshll.u32 %s1471_s10, 4  ;;  %p1418_p2 = scmp.ne.s32.totalorder %s1587_s2, %s1417_s14  ;;  %s41_s11 = int_to_ptr.vmem [resolvable:$true] %s40_s11 }
  0x25   :  { %p1421_p3 = scmp.lt.u32.totalorder %s1417_s14, %s1587_s2 }
  0x27   :  { %p1423_p4 = pnand %p1421_p3, %p1418_p2 }
  0x29   :  { %1426 = shalt.err (!%p1423_p4)
}
  0x2a   :  { %s1427_s20 = scalar_lea.vmem %s41_s11, 256  ;;  %p1432_p6 = scmp.lt.s32.totalorder %s41_s11, %s41_s11 }
  0x2b   :  { %p1428_p5 = scmp.ne.s32.totalorder %s41_s11, %s1427_s20  ;;  %p1433_p7 = scmp.lt.s32.totalorder %s1427_s20, %s1427_s20 }
  0x2d   :  { %p1434_p8 = por %p1433_p7, %p1432_p6 }
  0x2f   :  { %p1435_p9 = pnand %p1434_p8, %p1428_p5 }
  0x31   :  { %1438 = shalt.err (!%p1435_p9)
}
  0x32   :  { %46 = dma.hbm_to_vmem [thread:$0]  %s1587_s2, 256, %s41_s11, [#allocation6], %s1469_s24, %s1469_s24, %s1470_s25  }
  0x33   :  { %1461 = dma.done.wait [#allocation3], 256  }
  0x34   :  { %1462 = vsyncadd [#allocation3], 4294967040 }
  0x35   :  { %1463 = dma.done.wait [#allocation6], 512  }
  0x36   :  { %1464 = vsyncadd [#allocation6], 4294966784  ;;  %vm60_vm0 = vcmask 130048   ;;  %v1545_v0 = vld [vmem:[#allocation2] sm:$0xff]  ;;  %v1547_v1 = vld [vmem:[#allocation2 + $0x8] sm:$0xff]  ;;  %s1472_s2 = smov [#allocation8]  }
  0x37   :  { %v58_v2 = vld [vmem:[#allocation5] sm:$0xff]  ;;  %v68_v3 = vand.u32 4294901760, %v1545_v0  ;;  %v71_v4 = vand.u32 4294901760, %v1547_v1  ;;  %v59_v6 = vld [vmem:[#allocation5 + $0x8] sm:$0xff]  ;;  %v597_v34 = vld [vmem:[#allocation7] sm:$0xff]  ;;  %s1146_s21 = sshll.u32 %s1472_s2, 4  ;;  %s1147_s21 = int_to_ptr.vmem [resolvable:$true] %s1146_s21 }
  0x38   :  { %v62_v5 = vsel %vm60_vm0, %v58_v2, 0  ;;  %v65_v8 = vsel %vm60_vm0, %v59_v6, 0  ;;  %v600_v35 = vsel %vm60_vm0, %v597_v34, 0  ;;  %v598_v55 = vld [vmem:[#allocation7 + $0x8] sm:$0xff]  ;;  %s1439_s22 = scalar_lea.vmem %s1147_s21, 256  ;;  %p1444_p11 = scmp.lt.s32.totalorder %s1147_s21, %s1147_s21 }
  0x39   :  { %v134_v7 = vand.u32 4294901760, %v62_v5  ;;  %v1291_v9 = vpack.c.bf16 %v71_v4, %v68_v3  ;;  %v144_v10 = vand.u32 4294901760, %v65_v8  ;;  %v156_v11 = vsub.f32 %v1545_v0, %v68_v3  ;;  %p1440_p10 = scmp.ne.s32.totalorder %s1147_s21, %s1439_s22  ;;  %p1445_p12 = scmp.lt.s32.totalorder %s1439_s22, %s1439_s22 }
  0x3a   :  { %v163_v12 = vsub.f32 %v1547_v1, %v71_v4  ;;  %v1556_v36 = vand.u32 4294901760, %v600_v35  ;;  %v603_v58 = vsel %vm60_vm0, %v598_v55, 0 }
  0x3b   :  { %v135_v13 = vsub.f32 %v62_v5, %v134_v7  ;;  %1292 = vmatprep.subr.bf16.mxu0 %v1291_v9  ;;  %v145_v14 = vsub.f32 %v65_v8, %v144_v10  ;;  %v157_v15 = vand.u32 4294901760, %v156_v11  ;;  %v682_v59 = vand.u32 4294901760, %v603_v58  ;;  %p1446_p13 = por %p1445_p12, %p1444_p11 }
  0x3c   :  { %v164_v16 = vand.u32 4294901760, %v163_v12  ;;  %1294 = vmatpush3.bf16.msra.mxu0 %v1291_v9  ;;  %v1299_v28 = vpack.c.bf16 %v163_v12, %v156_v11  ;;  %v1559_v37 = vsub.f32 %v600_v35, %v1556_v36 }
  0x3d   :  { %v136_v17 = vand.u32 4294901760, %v135_v13  ;;  %v146_v18 = vand.u32 4294901760, %v145_v14  ;;  %v158_v19 = vsub.f32 %v156_v11, %v157_v15  ;;  %v683_v61 = vsub.f32 %v603_v58, %v682_v59  ;;  %p1447_p0 = pnand %p1446_p13, %p1440_p10 }
  0x3e   :  { %v165_v20 = vsub.f32 %v163_v12, %v164_v16  ;;  %v1307_v29 = vpack.c.bf16 %v164_v16, %v157_v15  ;;  %v674_v38 = vand.u32 4294901760, %v1559_v37 }
  0x3f   :  { %v137_v21 = vsub.f32 %v135_v13, %v136_v17  ;;  %v147_v22 = vsub.f32 %v145_v14, %v146_v18  ;;  %v159_v23 = vand.u32 4294901760, %v158_v19  ;;  %v684_v4 = vand.u32 4294901760, %v683_v61 }
  0x40   :  { %v166_v24 = vand.u32 4294901760, %v165_v20  ;;  %v675_v39 = vsub.f32 %v1559_v37, %v674_v38 }
  0x41   :  { %v138_v25 = vand.u32 4294901760, %v137_v21  ;;  %v148_v26 = vand.u32 4294901760, %v147_v22 }
  0x42   :  { %v1295_v27 = vpack.c.bf16 %v166_v24, %v159_v23  ;;  %v676_v40 = vand.u32 4294901760, %v675_v39 }
  0x43   :  { %1211 = vmatprep.mubr.f32.mxu0 %v138_v25 }
  0x44   :  { %1212 = vmatmul.mubr.f32.vlgmr.msra.gmra.mrb[0].mxu0 %v148_v26  ;;  %1296 = vmatprep.subr.bf16.mxu0 %v1295_v27 }
  0x45   :  { %1298 = vmatpush3.bf16.msra.mxu0 %v1295_v27  ;;  %1218 = vmatprep.mubr.f32.mxu0 %v134_v7 }
  0x46   :  { %1300 = vmatprep.subr.bf16.mxu0 %v1299_v28  ;;  %1253 = vmatprep.mubr.f32.mxu1 %v676_v40 }
  0x4c   :  { %1219 = vmatmul.mubr.f32.vlgmr.msra.gmra.mrb[0].mxu0 %v144_v10 }
  0x4d   :  { %1302 = vmatpush3.bf16.msra.mxu0 %v1299_v28  ;;  %1225 = vmatprep.mubr.f32.mxu0 %v135_v13 }
  0x4e   :  { %1304 = vmatprep.subr.bf16.mxu0 %v1291_v9 }
  0x54   :  { %1226 = vmatmul.mubr.f32.vlgmr.msra.gmra.mrb[0].mxu0 %v145_v14 }
  0x55   :  { %1306 = vmatpush3.bf16.msra.mxu0 %v1291_v9  ;;  %1232 = vmatprep.mubr.f32.mxu0 %v136_v17 }
  0x56   :  { %1308 = vmatprep.subr.bf16.mxu0 %v1307_v29 }
  0x5c   :  { %1233 = vmatmul.mubr.f32.vlgmr.msra.gmra.mrb[0].mxu0 %v146_v18 }
  0x5d   :  { %1310 = vmatpush3.bf16.msra.mxu0 %v1307_v29  ;;  %1239 = vmatprep.mubr.f32.mxu0 %v134_v7 }
  0x5e   :  { %1312 = vmatprep.subr.bf16.mxu0 %v1291_v9 }
  0x64   :  { %1240 = vmatmul.mubr.f32.vlgmr.msra.gmra.mrb[0].mxu0 %v144_v10 }
  0x65   :  { %1314 = vmatpush3.bf16.msra.mxu0 %v1291_v9  ;;  %1246 = vmatprep.mubr.f32.mxu0 %v134_v7  ;;  %v685_v9 = vsub.f32 %v683_v61, %v684_v4 }
  0x67   :  { %v686_v13 = vand.u32 4294901760, %v685_v9 }
  0x6c   :  { %1247 = vmatmul.mubr.f32.vlgmr.msra.gmra.mrb[0].mxu0 %v144_v10 }
 0x13f   :  { %v1248_v30 = vpop.f32.mrb[0].mxu0 }
 0x140   :  { %v559_v31 = vpop.f32.mrb[1].mxu0  ;;  %v574_v33 = vmul.f32 %v1248_v30, %v1248_v30 }
 0x141   :  { %569 = vadd.xlane.f32.xlu0 %v559_v31  ;;  %v573_v32 = vmul.f32 %v559_v31, %v559_v31 }
 0x143   :  { %575 = vadd.xlane.f32.xlu1 %v573_v32 }
 0x145   :  { %571 = vadd.xlane.f32.xlu0 %v1248_v30 }
 0x147   :  { %577 = vadd.xlane.f32.xlu1 %v574_v33 }
 0x1ce   :  { %v570_v41 = vpop.xlane.xlu0 %569 }
 0x1cf   :  { %v579_v42 = vmul.f32 0.0078125, %v570_v41 }
 0x1d0   :  { %v576_v43 = vpop.xlane.xlu1 %575 }
 0x1d1   :  { %v583_v44 = vmul.f32 %v579_v42, %v579_v42  ;;  %v581_v45 = vmul.f32 0.0078125, %v576_v43  ;;  %v589_v60 = vsub.f32 %v559_v31, %v579_v42 }
 0x1d2   :  { %v572_v46 = vpop.xlane.xlu0 %571 }
 0x1d3   :  { %v585_v47 = vsub.f32 %v581_v45, %v583_v44  ;;  %v580_v48 = vmul.f32 0.0078125, %v572_v46 }
 0x1d4   :  { %v578_v49 = vpop.xlane.xlu1 %577 }
 0x1d5   :  { %v587_v50 = vmax.f32 %v585_v47, 0.0  ;;  %v584_v51 = vmul.f32 %v580_v48, %v580_v48  ;;  %v582_v52 = vmul.f32 0.0078125, %v578_v49  ;;  %v590_v3 = vsub.f32 %v1248_v30, %v580_v48 }
 0x1d7   :  { %v591_v53 = vadd.f32 1e-05, %v587_v50  ;;  %v586_v54 = vsub.f32 %v582_v52, %v584_v51 }
 0x1d9   :  { %1365 = vrsqrt.f32 %v591_v53  ;;  %v588_v56 = vmax.f32 %v586_v54, 0.0 }
 0x1db   :  { %v592_v57 = vadd.f32 1e-05, %v588_v56 }
 0x1dd   :  { %1367 = vrsqrt.f32 %v592_v57 }
 0x1e3   :  { %v1366_v62 = vpop.eup %1365 }
 0x1e4   :  { %v595_v63 = vmul.f32 %v1366_v62, %v589_v60 }
 0x1e6   :  { %v606_v2 = vand.u32 4294901760, %v595_v63 }
 0x1e7   :  { %v1368_v5 = vpop.eup %1367 }
 0x1e8   :  { %v596_v6 = vmul.f32 %v1368_v5, %v590_v3  ;;  %v694_v7 = vsub.f32 %v595_v63, %v606_v2 }
 0x1ea   :  { %v609_v8 = vand.u32 4294901760, %v596_v6  ;;  %v695_v10 = vand.u32 4294901760, %v694_v7 }
 0x1ec   :  { %v1315_v11 = vpack.c.bf16 %v609_v8, %v606_v2  ;;  %v701_v12 = vsub.f32 %v596_v6, %v609_v8  ;;  %v696_v14 = vsub.f32 %v694_v7, %v695_v10 }
 0x1ee   :  { %1316 = vmatprep.subr.bf16.mxu1 %v1315_v11  ;;  %v702_v15 = vand.u32 4294901760, %v701_v12  ;;  %v1323_v16 = vpack.c.bf16 %v701_v12, %v694_v7  ;;  %v697_v19 = vand.u32 4294901760, %v696_v14 }
 0x1ef   :  { %1318 = vmatpush3.bf16.msra.mxu1 %v1315_v11 }
 0x1f0   :  { %v703_v17 = vsub.f32 %v701_v12, %v702_v15  ;;  %v1331_v18 = vpack.c.bf16 %v702_v15, %v695_v10 }
 0x1f2   :  { %1254 = vmatmul.mubr.f32.vlgmr.msra.gmra.mrb[0].mxu1 %v686_v13  ;;  %v704_v20 = vand.u32 4294901760, %v703_v17 }
 0x1f3   :  { %1260 = vmatprep.mubr.f32.mxu1 %v1556_v36 }
 0x1f4   :  { %v1319_v21 = vpack.c.bf16 %v704_v20, %v697_v19 }
 0x1f6   :  { %1320 = vmatprep.subr.bf16.mxu1 %v1319_v21 }
 0x1f7   :  { %1322 = vmatpush3.bf16.msra.mxu1 %v1319_v21 }
 0x1f8   :  { %1324 = vmatprep.subr.bf16.mxu1 %v1323_v16 }
 0x1fa   :  { %1261 = vmatmul.mubr.f32.vlgmr.msra.gmra.mrb[0].mxu1 %v682_v59 }
 0x1fb   :  { %1326 = vmatpush3.bf16.msra.mxu1 %v1323_v16  ;;  %1267 = vmatprep.mubr.f32.mxu1 %v1559_v37 }
 0x1fc   :  { %1328 = vmatprep.subr.bf16.mxu1 %v1315_v11 }
 0x202   :  { %1268 = vmatmul.mubr.f32.vlgmr.msra.gmra.mrb[0].mxu1 %v683_v61 }
 0x203   :  { %1330 = vmatpush3.bf16.msra.mxu1 %v1315_v11  ;;  %1274 = vmatprep.mubr.f32.mxu1 %v674_v38 }
 0x204   :  { %1332 = vmatprep.subr.bf16.mxu1 %v1331_v18 }
 0x20a   :  { %1275 = vmatmul.mubr.f32.vlgmr.msra.gmra.mrb[0].mxu1 %v684_v4 }
 0x20b   :  { %1334 = vmatpush3.bf16.msra.mxu1 %v1331_v18  ;;  %1281 = vmatprep.mubr.f32.mxu1 %v1556_v36 }
 0x20c   :  { %1336 = vmatprep.subr.bf16.mxu1 %v1315_v11 }
 0x212   :  { %1282 = vmatmul.mubr.f32.vlgmr.msra.gmra.mrb[0].mxu1 %v682_v59 }
 0x213   :  { %1338 = vmatpush3.bf16.msra.mxu1 %v1315_v11  ;;  %1288 = vmatprep.mubr.f32.mxu1 %v1556_v36 }
 0x21a   :  { %1289 = vmatmul.mubr.f32.vlgmr.msra.gmra.mrb[0].mxu1 %v682_v59 }
 0x2ed   :  { %v1290_v22 = vpop.f32.mrb[0].mxu1 }
 0x2ee   :  { %1109 = vadd.xlane.f32.xlu1 %v1290_v22  ;;  %v1097_v23 = vpop.f32.mrb[1].mxu1  ;;  %v1112_v24 = vmul.f32 %v1290_v22, %v1290_v22 }
 0x2ef   :  { %1107 = vadd.xlane.f32.xlu0 %v1097_v23  ;;  %v1111_v25 = vmul.f32 %v1097_v23, %v1097_v23 }
 0x2f2   :  { %1115 = vadd.xlane.f32.xlu1 %v1112_v24 }
 0x2f3   :  { %1113 = vadd.xlane.f32.xlu0 %v1111_v25 }
 0x37b   :  { %v1110_v26 = vpop.xlane.xlu1 %1109 }
 0x37c   :  { %v1118_v27 = vmul.f32 0.0078125, %v1110_v26  ;;  %v1108_v28 = vpop.xlane.xlu0 %1107 }
 0x37d   :  { %v1117_v29 = vmul.f32 0.0078125, %v1108_v28 }
 0x37e   :  { %v1122_v31 = vmul.f32 %v1118_v27, %v1118_v27  ;;  %v1128_v42 = vsub.f32 %v1290_v22, %v1118_v27 }
 0x37f   :  { %v1116_v30 = vpop.xlane.xlu1 %1115  ;;  %v1121_v34 = vmul.f32 %v1117_v29, %v1117_v29  ;;  %v1127_v44 = vsub.f32 %v1097_v23, %v1117_v29 }
 0x380   :  { %v1120_v32 = vmul.f32 0.0078125, %v1116_v30  ;;  %v1114_v33 = vpop.xlane.xlu0 %1113 }
 0x381   :  { %v1119_v35 = vmul.f32 0.0078125, %v1114_v33 }
 0x382   :  { %v1124_v36 = vsub.f32 %v1120_v32, %v1122_v31 }
 0x383   :  { %v1123_v37 = vsub.f32 %v1119_v35, %v1121_v34 }
 0x384   :  { %v1126_v38 = vmax.f32 %v1124_v36, 0.0 }
 0x385   :  { %v1125_v39 = vmax.f32 %v1123_v37, 0.0 }
 0x386   :  { %v1130_v40 = vadd.f32 1e-05, %v1126_v38 }
 0x387   :  { %v1129_v41 = vadd.f32 1e-05, %v1125_v39 }
 0x388   :  { %1369 = vrsqrt.f32 %v1130_v40 }
 0x389   :  { %1371 = vrsqrt.f32 %v1129_v41 }
 0x392   :  { %v1370_v43 = vpop.eup %1369 }
 0x393   :  { %v1372_v45 = vpop.eup %1371  ;;  %v1134_v46 = vmul.f32 %v1370_v43, %v1128_v42 }
 0x394   :  { %v1133_v47 = vmul.f32 %v1372_v45, %v1127_v44 }
 0x395   :  { %v1136_v48 = vmax.f32 %v1134_v46, 0.0 }
 0x396   :  { %v1135_v49 = vmax.f32 %v1133_v47, 0.0 }
 0x397   :  { %v1138_v50 = vadd.f32 %v1136_v48, %v1547_v1 }
 0x398   :  { %v1137_v51 = vadd.f32 %v1135_v49, %v1545_v0 }
 0x399   :  { %1140 = vst [vmem:[#allocation8 + $0x8] sm:$0xff] %v1138_v50 }
 0x39a   :  { %1139 = vst [vmem:[#allocation8] sm:$0xff] %v1137_v51 }
 0x39b   :  { %1450 = shalt.err (!%p1447_p0)
}
 0x39c   :  { %s1451_s27 = scalar_lea.hbm %s1588_s3, 256 }
 0x39d   :  { %p1452_p1 = scmp.ne.s32.totalorder %s1588_s3, %s1451_s27  ;;  %p1455_p2 = scmp.lt.u32.totalorder %s1451_s27, %s1588_s3 }
 0x39f   :  { %p1457_p3 = pnand %p1455_p2, %p1452_p1 }
 0x3a1   :  { %1460 = shalt.err (!%p1457_p3)
}
 0x3a2   :  { %1152 = dma.vmem_to_hbm [thread:$0]  %s1147_s21, 256, %s1588_s3, [#allocation4], %s1469_s24, %s1469_s24, %s1470_s25  }
 0x3a3   :  { %1465 = dma.done.wait [#allocation4], 256  }
 0x3a4   :  { %1466 = vsyncadd [#allocation4], 4294967040 }
 0x3a5   :  { %1156 = vsyncpa [#allocation3], 1 }
 0x3a6   :  { %1157 = vsyncpa [#allocation6], 1 }
 0x3a7   :  { %1158 = vsyncpa [#allocation4], 1 }

</bundles_post_ra>
